<compile_context>
chip_gen: v5e
topology: v5e:2x2
jax: 0.10.0
libtpu: 0.0.40
codegen_flags: <defaults>
</compile_context>

<pallas_src>
import functools

import jax
import jax.numpy as jnp
from jax import lax
from jax.experimental import pallas as pl
from jax.experimental.pallas import tpu as pltpu


def _round_up(x, m):
    return ((x + m - 1) // m) * m


def _cdiv(a, b):
    return (a + b - 1) // b


def _vmem_budget_bytes():
    """~75% of physical per-core VMEM (generation-aware), conservative fallback."""
    cap = None
    try:
        info = pltpu.get_tpu_info()
        cap = getattr(info, "vmem_capacity_bytes", None)
    except Exception:
        cap = None
    if not cap:
        cap = 64 << 20  # smallest per-core VMEM across supported gens (v7x)
    return int(cap) * 3 // 4


def _choose_tiles(m, k, n, itemsize, budget):
    """Pick (tm, tn, tk). tk == k means the reduction is untiled."""
    sub = {1: 32, 2: 16, 4: 8}.get(itemsize, 8)   # sublane multiple per dtype

    def fits(tm, tn, tk):
        # double-buffered activation / weight / bias / output tiles
        ws = 2 * (tm * tk + tk * tn + tn + tm * tn) * itemsize
        if tk < k:
            ws += tm * tn * 4                     # f32 accumulator scratch
        return ws + (2 << 20) <= budget           # headroom for compiler scratch

    tk_cands = [t for t in (4096, 2048, 1024, 512, 256, 128) if t < k]
    tn_cands = [t for t in (1024, 512, 256, 128) if t < n]

    # Preference order:
    #   1) full-N resident, K untiled (true weight residency, lane-dense stores)
    #   2) full-N resident, K tiled
    #   3) N tiled (128-multiples), K untiled
    #   4) N and K tiled
    cands = [(n, k)]
    cands += [(n, tk) for tk in tk_cands]
    cands += [(tn, k) for tn in tn_cands]
    cands += [(tn, tk) for tn in tn_cands for tk in tk_cands]

    tm_pref = []
    for cap in (512, 256, 128, sub):
        tm = _round_up(min(m, cap), sub)
        if tm not in tm_pref:
            tm_pref.append(tm)

    for tm in tm_pref:
        for tn, tk in cands:
            if fits(tm, tn, tk):
                return tm, tn, tk
    # Always-feasible last resort (a few hundred KiB of VMEM at most).
    return sub, min(128, n), min(128, k)


def _linear_kernel(x_ref, w_ref, b_ref, o_ref, *, compute_dtype):
    # Single-shot (TM, K) @ (K, TN) + (1, TN); f32 accumulation on the MXU.
    x = x_ref[...]
    w = w_ref[...]
    if compute_dtype is not None:
        x = x.astype(compute_dtype)
        w = w.astype(compute_dtype)
    acc = jnp.dot(x, w, preferred_element_type=jnp.float32)
    o_ref[...] = (acc + b_ref[...].astype(jnp.float32)).astype(o_ref.dtype)


def _linear_kernel_ktiled(x_ref, w_ref, b_ref, o_ref, acc_ref, *,
                          k_total, tk, compute_dtype):
    # K-tiled matmul with a persistent f32 accumulator; k is the innermost
    # ("arbitrary") grid axis so the output block stays resident across it.
    kk = pl.program_id(2)

    @pl.when(kk == 0)
    def _zero():
        acc_ref[...] = jnp.zeros_like(acc_ref)

    x = x_ref[...]
    w = w_ref[...]
    if k_total % tk != 0:
        # Ragged last K tile: Pallas pads boundary reads with unspecified
        # values; zero both sides so the padded products contribute exactly 0.
        valid = k_total - kk * tk
        x = jnp.where(
            lax.broadcasted_iota(jnp.int32, x.shape, 1) < valid,
            x, jnp.zeros_like(x))
        w = jnp.where(
            lax.broadcasted_iota(jnp.int32, w.shape, 0) < valid,
            w, jnp.zeros_like(w))
    if compute_dtype is not None:
        x = x.astype(compute_dtype)
        w = w.astype(compute_dtype)

    acc_ref[...] += jnp.dot(x, w, preferred_element_type=jnp.float32)

    @pl.when(kk == pl.num_programs(2) - 1)
    def _store():
        o_ref[...] = (acc_ref[...] + b_ref[...].astype(jnp.float32)
                      ).astype(o_ref.dtype)


def _pallas_linear(x_flat, w_t, b_row, *, compute_dtype=None, _tiles=None):
    """x_flat: (M, K), w_t: (K, N), b_row: (1, N) -> (M, N). No wrapper padding."""
    m, k = x_flat.shape
    n = w_t.shape[1]
    itemsize = jnp.dtype(x_flat.dtype).itemsize
    budget = _vmem_budget_bytes()

    if _tiles is None:
        tm, tn, tk = _choose_tiles(m, k, n, itemsize, budget)
    else:
        tm, tn, tk = _tiles  # testing hook

    grid_m = _cdiv(m, tm)
    grid_n = _cdiv(n, tn)
    k_tiled = tk < k

    # vmem_limit: working set + headroom, capped by the per-generation budget.
    ws = 2 * (tm * tk + tk * tn + tn + tm * tn) * itemsize
    if k_tiled:
        ws += tm * tn * 4
    vmem_limit = int(min(budget, max(ws + (4 << 20), 16 << 20)))

    cost = pl.CostEstimate(
        flops=2 * m * k * n,
        transcendentals=0,
        bytes_accessed=(m * k + k * n + n + m * n) * itemsize)

    if not k_tiled:
        kernel = functools.partial(_linear_kernel, compute_dtype=compute_dtype)
        grid = (grid_m, grid_n)
        in_specs = [
            pl.BlockSpec((tm, k), lambda i, j: (i, 0)),    # activations
            pl.BlockSpec((k, tn), lambda i, j: (0, j)),    # weight (K, N)
            pl.BlockSpec((1, tn), lambda i, j: (0, j)),    # bias row
        ]
        out_specs = pl.BlockSpec((tm, tn), lambda i, j: (i, j))
        scratch_shapes = []
        semantics = ("parallel", "parallel")
    else:
        grid_k = _cdiv(k, tk)
        kernel = functools.partial(_linear_kernel_ktiled, k_total=k, tk=tk,
                                   compute_dtype=compute_dtype)
        grid = (grid_m, grid_n, grid_k)
        in_specs = [
            pl.BlockSpec((tm, tk), lambda i, j, kk: (i, kk)),
            pl.BlockSpec((tk, tn), lambda i, j, kk: (kk, j)),
            pl.BlockSpec((1, tn), lambda i, j, kk: (0, j)),
        ]
        out_specs = pl.BlockSpec((tm, tn), lambda i, j, kk: (i, j))
        scratch_shapes = [pltpu.VMEM((tm, tn), jnp.float32)]
        semantics = ("parallel", "parallel", "arbitrary")

    return pl.pallas_call(
        kernel,
        out_shape=jax.ShapeDtypeStruct((m, n), x_flat.dtype),
        grid=grid,
        in_specs=in_specs,
        out_specs=out_specs,
        scratch_shapes=scratch_shapes,
        compiler_params=pltpu.CompilerParams(
            dimension_semantics=semantics,
            vmem_limit_bytes=vmem_limit),
        cost_estimate=cost,
    )(x_flat, w_t, b_row)


def time_distributed_linear(x, weight, bias, batch_first=True,
                            use_pallas=None, compute_dtype=None):
    """TimeDistributed(Linear) forward.

    x      : (B, T, ..., F) (rank > 2; last dim = in_features)
    weight : (out_features, in_features)   -- PyTorch nn.Linear convention
    bias   : (out_features,)
    compute_dtype : optional (e.g. jnp.bfloat16) MXU compute dtype; f32 accum.
    """
    assert x.ndim > 2, "TimeDistributed expects input with >2 dims"
    in_features = x.shape[-1]
    out_features = weight.shape[0]
    assert weight.shape[1] == in_features

    x_flat = x.reshape(-1, in_features)
    m = x_flat.shape[0]

    if use_pallas is None:
        # Tiny GEMMs: XLA's fused dot beats pallas_call fixed overhead.
        use_pallas = (m * in_features * out_features) > 1_000_000

    if use_pallas:
        # weight.T is hoisted/folded by XLA under jit when the weight is a
        # constant parameter; kept here instead of an in-kernel trans_b dot.
        w_t = weight.T
        b_row = bias.reshape(1, out_features)
        out_flat = _pallas_linear(x_flat, w_t, b_row,
                                  compute_dtype=compute_dtype)
    else:
        out_flat = x_flat @ weight.T + bias

    if batch_first:
        return out_flat.reshape(x.shape[0], -1, out_features)
    return out_flat.reshape(-1, x.shape[1], out_features)


if __name__ == "__main__":
    key = jax.random.PRNGKey(0)

    # ---- Test 1: module-consistent small shape (batch=2, seq=8, feat=32->64)
    B, T, F, OUT = 2, 8, 32, 64
    kx, kw, kb = jax.random.split(key, 3)
    x = jax.random.normal(kx, (B, T, F), dtype=jnp.float32)
    weight = jax.random.normal(kw, (OUT, F), dtype=jnp.float32) * 0.05
    bias = jax.random.normal(kb, (OUT,), dtype=jnp.float32) * 0.05

    out = time_distributed_linear(x, weight, bias, batch_first=True,
                                  use_pallas=True)   # force the Pallas path
    out = jax.block_until_ready(out)
    ref = (x.reshape(-1, F) @ weight.T + bias).reshape(B, -1, OUT)
    assert out.shape == (B, T, OUT), out.shape
    assert jnp.allclose(out, ref, atol=1e-5, rtol=1e-5)

    # batch_first=False branch of the reshape logic.
    out_nf = jax.block_until_ready(
        time_distributed_linear(x, weight, bias, batch_first=False,
                                use_pallas=True))
    assert jnp.allclose(out_nf, ref.reshape(-1, T, OUT), atol=1e-5, rtol=1e-5)

    # ---- Test 2: exercise the K-tiled accumulator kernel with ragged M/K and
    # multi-block N via the testing hook (small shapes, forced small tiles).
    B2, T2, F2, OUT2 = 4, 15, 160, 256          # M=60 (ragged), K=160 (ragged)
    k2 = jax.random.PRNGKey(1)
    kx2, kw2, kb2 = jax.random.split(k2, 3)
    x2 = jax.random.normal(kx2, (B2, T2, F2), dtype=jnp.float32)
    w2 = jax.random.normal(kw2, (OUT2, F2), dtype=jnp.float32) * 0.05
    b2 = jax.random.normal(kb2, (OUT2,), dtype=jnp.float32) * 0.05
    out2 = jax.block_until_ready(
        _pallas_linear(x2.reshape(-1, F2), w2.T, b2.reshape(1, OUT2),
                       _tiles=(32, 128, 128)))
    ref2 = x2.reshape(-1, F2) @ w2.T + b2
    assert out2.shape == (B2 * T2, OUT2), out2.shape
    assert jnp.allclose(out2, ref2, atol=2e-3, rtol=2e-3)

    # ---- Test 3: auto-dispatch (small-shape fallback) path.
    out_auto = jax.block_until_ready(
        time_distributed_linear(x, weight, bias, batch_first=True))
    assert jnp.allclose(out_auto, ref, atol=1e-5, rtol=1e-5)

    print("KERNEL_OK")
</pallas_src>

<mosaic_0001>
module attributes {stable_mosaic.version = 11 : i64} {
  func.func @_linear_kernel(%arg0: i32, %arg1: i32, %arg2: memref<16x32xf32, #tpu.memory_space<vmem>>, %arg3: memref<32x64xf32, #tpu.memory_space<vmem>>, %arg4: memref<1x64xf32, #tpu.memory_space<vmem>>, %arg5: memref<16x64xf32, #tpu.memory_space<vmem>>) attributes {dimension_semantics = [#tpu.dimension_semantics<parallel>, #tpu.dimension_semantics<parallel>], iteration_bounds = array<i64: 1, 1>, scalar_prefetch = 0 : i64, scratch_operands = 0 : i64, tpu.core_type = #tpu.core_type<tc>, window_params = [{transform_indices = @transform_0, window_bounds = array<i64: 16, 32>}, {transform_indices = @transform_1, window_bounds = array<i64: 32, 64>}, {transform_indices = @transform_2, window_bounds = array<i64: 1, 64>}, {transform_indices = @transform_3, window_bounds = array<i64: 16, 64>}]} {
    %c0 = arith.constant 0 : index
    %c0_0 = arith.constant 0 : index
    %0 = vector.load %arg2[%c0, %c0_0] : memref<16x32xf32, #tpu.memory_space<vmem>>, vector<16x32xf32>
    %c0_1 = arith.constant 0 : index
    %c0_2 = arith.constant 0 : index
    %1 = vector.load %arg3[%c0_1, %c0_2] : memref<32x64xf32, #tpu.memory_space<vmem>>, vector<32x64xf32>
    %cst = arith.constant dense<0.000000e+00> : vector<16x64xf32>
    %2 = tpu.matmul %0, %1, %cst {dimension_numbers = #tpu.dot_dimension_numbers<[1], [0], [0], [1], [0, 0, 1, 1], [], []>} : vector<16x32xf32>, vector<32x64xf32>, vector<16x64xf32> -> vector<16x64xf32>
    %c0_3 = arith.constant 0 : index
    %c0_4 = arith.constant 0 : index
    %3 = vector.load %arg4[%c0_3, %c0_4] : memref<1x64xf32, #tpu.memory_space<vmem>>, vector<1x64xf32>
    %4 = vector.broadcast %3 : vector<1x64xf32> to vector<16x64xf32>
    %5 = arith.addf %2, %4 : vector<16x64xf32>
    %c0_5 = arith.constant 0 : index
    %c0_6 = arith.constant 0 : index
    %6 = vector.load %arg5[%c0_5, %c0_6] : memref<16x64xf32, #tpu.memory_space<vmem>>, vector<16x64xf32>
    tpu.vector_store %arg5[%c0_5, %c0_6], %5 {strides = array<i32>} : memref<16x64xf32, #tpu.memory_space<vmem>>, vector<16x64xf32>,
    return
  }
  func.func @transform_0(%arg0: i32, %arg1: i32) -> (i32, i32) {
    %c0_i32 = arith.constant 0 : i32
    %c0_i32_0 = arith.constant 0 : i32
    return %arg0, %c0_i32 : i32, i32
  }
  func.func @transform_1(%arg0: i32, %arg1: i32) -> (i32, i32) {
    %c0_i32 = arith.constant 0 : i32
    %c0_i32_0 = arith.constant 0 : i32
    return %c0_i32, %arg1 : i32, i32
  }
  func.func @transform_2(%arg0: i32, %arg1: i32) -> (i32, i32) {
    %c0_i32 = arith.constant 0 : i32
    %c0_i32_0 = arith.constant 0 : i32
    return %c0_i32, %arg1 : i32, i32
  }
  func.func @transform_3(%arg0: i32, %arg1: i32) -> (i32, i32) {
    %c0_i32 = arith.constant 0 : i32
    return %arg0, %arg1 : i32, i32
  }
}

</mosaic_0001>

<bundles_post_ra>
// kernel: tpu_custom_call.1
= control target key start
LH: loop header
LB: loop body
LE: loop exit
PB: predicated region body
PF: predicated region fallthrough
CT: control target
= control target key end

     0   :  { %8 = vsyncpa [#allocation3], 0  ;;  %s246_s0 = inlined_call_operand.hbm [shape: f32[16,32], index: 0, kind: input, shape index: {}]   ;;  %s247_s1 = inlined_call_operand.hbm [shape: f32[32,64], index: 1, kind: input, shape index: {}]   ;;  %s248_s2 = inlined_call_operand.vmem [shape: f32[1,64], index: 2, kind: input, shape index: {}]   ;;  %s249_s3 = inlined_call_operand.hbm [shape: f32[16,64], index: 3, kind: output, shape index: {}]  }
   0x1   :  { %9 = vsyncpa [#allocation6], 0 }
   0x2   :  { %10 = vsyncpa [#allocation4], 0  ;;  %s15_s14 = sshll.u32 %s246_s0, 4  ;;  %s200_s15 = smov [#allocation2]   ;;  %s16_s14 = int_to_ptr.hbm [resolvable:$true] %s15_s14 }
   0x3   :  { %s17_s16 = sshll.u32 %s200_s15, 4  ;;  %s28_s19 = sshll.u32 %s247_s1, 4  ;;  %s18_s16 = int_to_ptr.vmem [resolvable:$true] %s17_s16  ;;  %s29_s19 = int_to_ptr.hbm [resolvable:$true] %s28_s19 }
   0x4   :  { %s201_s20 = smov 128   ;;  %s202_s21 = smov 8  }
   0x5   :  { %23 = dma.hbm_to_vmem [thread:$0]  %s16_s14, 256, %s18_s16, [#allocation3], %s201_s20, %s201_s20, %s202_s21  }
   0x6   :  { %s203_s22 = smov [#allocation5]  }
   0x7   :  { %s30_s23 = sshll.u32 %s203_s22, 4  ;;  %s31_s23 = int_to_ptr.vmem [resolvable:$true] %s30_s23 }
   0x8   :  { %36 = dma.hbm_to_vmem [thread:$0]  %s29_s19, 512, %s31_s23, [#allocation6], %s201_s20, %s201_s20, %s202_s21  }
   0x9   :  { %194 = dma.done.wait [#allocation3], 256  }
   0xa   :  { %195 = vsyncadd [#allocation3], 4294967040 }
   0xb   :  { %196 = dma.done.wait [#allocation6], 512  }
   0xc   :  { %197 = vsyncadd [#allocation6], 4294966784  ;;  %v52_v0 = vld [vmem:[#allocation5 + $0x18] sm:$0xff]  ;;  %v51_v1 = vld [vmem:[#allocation5 + $0x10] sm:$0xff]  ;;  %vm57_vm0 = vcmask 261120   ;;  %s204_s24 = smov [#allocation7]  }
   0xd   :  { %76 = vmatpush.msra.mxu0 %v52_v0  ;;  %112 = vmatpush.msra.mxu1 %v52_v0  ;;  %v50_v2 = vld [vmem:[#allocation5 + $0x8] sm:$0xff]  ;;  %v49_v3 = vld [vmem:[#allocation5] sm:$0xff]  ;;  %v47_v4 = vld [vmem:[#allocation2] sm:$0xff]  ;;  %s94_s25 = sshll.u32 %s204_s24, 4  ;;  %s96_s28 = sshll.u32 %s249_s3, 4  ;;  %vm87_vm1 = vcmask 523264   ;;  %s95_s25 = int_to_ptr.vmem [resolvable:$true] %s94_s25  ;;  %s97_s28 = int_to_ptr.hbm [resolvable:$true] %s96_s28 }
   0xe   :  { %v48_v5 = vld [vmem:[#allocation2 + $0x8] sm:$0xff]  ;;  %v121_v6 = vld [vmem:[%s248_s2] ss:$0 sm:$0xff] }
   0xf   :  { %77 = vmatpush.msra.mxu0 %v51_v1  ;;  %113 = vmatpush.msra.mxu1 %v51_v1 }
  0x11   :  { %78 = vmatpush.msra.mxu0 %v50_v2  ;;  %114 = vmatpush.msra.mxu1 %v50_v2 }
  0x13   :  { %79 = vmatpush.msra.mxu0 %v49_v3  ;;  %115 = vmatpush.msra.mxu1 %v49_v3 }
  0x14   :  { %110 = vmatmul.msk.f32.vlgmr.msra.gmra.mxu0 %vm57_vm0, %v47_v4  ;;  %111 = vmatmul.msk.f32.vlgmr.msra.gmra.mxu1 %vm57_vm0, %v48_v5 }
  0x91   :  { %v81_v7 = vpop.f32.mrf.mxu0  ;;  %v84_v8 = vpop.f32.mrf.mxu1 }
  0x92   :  { %v82_v9 = vadd.f32 %v121_v6, %v81_v7  ;;  %v85_v10 = vadd.f32 %v121_v6, %v84_v8 }
  0x94   :  { %88 = vst.msk [vmem:[#allocation7] sm:$0xff] %vm87_vm1, %v82_v9 }
  0x95   :  { %89 = vst.msk [vmem:[#allocation7 + $0x8] sm:$0xff] %vm87_vm1, %v85_v10 }
  0x96   :  { %102 = dma.vmem_to_hbm [thread:$0]  %s95_s25, 256, %s97_s28, [#allocation4], %s201_s20, %s201_s20, %s202_s21  }
  0x97   :  { %198 = dma.done.wait [#allocation4], 256  }
  0x98   :  { %199 = vsyncadd [#allocation4], 4294967040 }
  0x99   :  { %107 = vsyncpa [#allocation3], 1 }
  0x9a   :  { %108 = vsyncpa [#allocation6], 1 }
  0x9b   :  { %109 = vsyncpa [#allocation4], 1 }

</bundles_post_ra>
